<compile_context>
chip_gen: v5e
topology: v5e:2x2
jax: 0.10.0
libtpu: 0.0.40
codegen_flags: <defaults>
</compile_context>

<pallas_src>
import jax
import jax.numpy as jnp
from jax.experimental import pallas as pl
from jax.experimental.pallas import tpu as pltpu


def conv_relu_kernel(xp_ref, bw_ref, bias_ref, o_ref):
    # xp_ref  : (H+2, (W+2)*Cin)  padded input, one batch element (VMEM-resident
    #                             across the row-tile grid axis)
    # bw_ref  : (3, (W+2)*Cin, W*Cout)  banded conv weights (resident)
    # bias_ref: (1, W*Cout)             bias tiled across W (resident)
    # o_ref   : (BH, W*Cout)            lane-dense output row strip
    bh = o_ref.shape[0]
    h = pl.program_id(1)
    row0 = h * bh
    if bh % 8 == 0:
        row0 = pl.multiple_of(row0, 8)   # sublane-aligned strip base

    # 3x3 conv = 3 MXU matmuls (one per ky); kx taps + channel contraction are
    # folded into the banded weight, so no per-tap relayout is needed.
    acc = jnp.dot(xp_ref[pl.ds(row0, bh), :], bw_ref[0],
                  preferred_element_type=jnp.float32)
    acc = acc + jnp.dot(xp_ref[pl.ds(row0 + 1, bh), :], bw_ref[1],
                        preferred_element_type=jnp.float32)
    acc = acc + jnp.dot(xp_ref[pl.ds(row0 + 2, bh), :], bw_ref[2],
                        preferred_element_type=jnp.float32)

    acc = acc + bias_ref[...].astype(jnp.float32)     # (1, W*Cout) broadcast
    o_ref[...] = jnp.maximum(acc, 0.0).astype(o_ref.dtype)


def conv_relu(x_nchw, weight, bias, *, block_h=None):
    """x_nchw: (N, Cin, H, W); weight: (Cout, Cin, 3, 3) [PyTorch OIHW layout];
    bias: (Cout,). Returns (N, Cout, H, W) = ReLU(conv3x3(x) + bias)."""
    N, Cin, H, W = x_nchw.shape
    Cout = weight.shape[0]

    if block_h is None:
        block_h = 8 if H % 8 == 0 else H      # (8, 128)-aligned output strips
    assert H % block_h == 0
    num_h = H // block_h

    # --- wrapper glue (fuses under jit): layout + zero-pad + banded weights ---
    # NCHW -> NHWC, pad H/W by 1, flatten (W+2, Cin) onto the lane axis.
    x_nhwc = jnp.transpose(x_nchw, (0, 2, 3, 1))                  # (N, H, W, Cin)
    x_pad = jnp.pad(x_nhwc, ((0, 0), (1, 1), (1, 1), (0, 0)))     # (N, H+2, W+2, Cin)
    x2 = x_pad.reshape(N, H + 2, (W + 2) * Cin)

    # Banded weight: B[ky, (x+kx)*Cin + ci, x*Cout + co] = w[ky, kx, ci, co].
    w_hwio = jnp.transpose(weight, (2, 3, 1, 0)).astype(jnp.float32)  # (3,3,Cin,Cout)
    shift_eye = jnp.stack(
        [jnp.eye(W + 2, W, k=-kx, dtype=jnp.float32) for kx in range(3)])  # (3, W+2, W)
    bw = jnp.einsum("kXx,ykio->yXixo", shift_eye, w_hwio)
    bw = bw.reshape(3, (W + 2) * Cin, W * Cout)

    bias_tiled = jnp.tile(bias.astype(jnp.float32), W).reshape(1, W * Cout)

    out2 = pl.pallas_call(
        conv_relu_kernel,
        out_shape=jax.ShapeDtypeStruct((N, H, W * Cout), x_nchw.dtype),
        grid_spec=pltpu.PrefetchScalarGridSpec(
            num_scalar_prefetch=0,
            grid=(N, num_h),
            in_specs=[
                # Full padded image per batch element; block index constant in h
                # -> stays VMEM-resident across row tiles (no re-DMA per step).
                pl.BlockSpec((None, H + 2, (W + 2) * Cin), lambda n, h: (n, 0, 0)),
                # Banded weights / bias: constant index map -> resident.
                pl.BlockSpec((3, (W + 2) * Cin, W * Cout), lambda n, h: (0, 0, 0)),
                pl.BlockSpec((1, W * Cout), lambda n, h: (0, 0)),
            ],
            out_specs=pl.BlockSpec((None, block_h, W * Cout), lambda n, h: (n, h, 0)),
        ),
        compiler_params=pltpu.CompilerParams(
            dimension_semantics=("parallel", "arbitrary"),
        ),
    )(x2, bw, bias_tiled)

    # Back to PyTorch NCHW semantics (skip if the consumer can take (N,H,W*Cout)).
    out = out2.reshape(N, H, W, Cout)
    return jnp.transpose(out, (0, 3, 1, 2))


conv_relu = jax.jit(conv_relu, static_argnames=("block_h",))


if __name__ == "__main__":
    # Small shapes consistent with ConvRelu(in_=4, out=8) on a 16x16 image.
    N, Cin, H, W = 2, 4, 16, 16
    Cout = 8

    key = jax.random.PRNGKey(0)
    kx, kw, kb = jax.random.split(key, 3)

    x = jax.random.normal(kx, (N, Cin, H, W), dtype=jnp.float32)
    fan_in = Cin * 3 * 3
    bound = 1.0 / (fan_in ** 0.5)
    weight = jax.random.uniform(kw, (Cout, Cin, 3, 3), jnp.float32, -bound, bound)
    bias = jax.random.uniform(kb, (Cout,), jnp.float32, -bound, bound)

    out = conv_relu(x, weight, bias)
    out = jax.block_until_ready(out)

    # Sanity check against XLA's conv (not part of the kernel hot path).
    ref = jax.lax.conv_general_dilated(
        x, weight, window_strides=(1, 1), padding=((1, 1), (1, 1)),
        dimension_numbers=("NCHW", "OIHW", "NCHW"),
    ) + bias.reshape(1, Cout, 1, 1)
    ref = jnp.maximum(ref, 0.0)

    assert out.shape == (N, Cout, H, W)
    assert jnp.allclose(out, ref, atol=1e-4, rtol=1e-4)

    print("KERNEL_OK")
</pallas_src>

<mosaic_0001>
module attributes {stable_mosaic.version = 11 : i64} {
  func.func @conv_relu_kernel(%arg0: i32, %arg1: i32, %arg2: memref<1x18x72xf32, #tpu.memory_space<vmem>>, %arg3: memref<3x72x128xf32, #tpu.memory_space<vmem>>, %arg4: memref<1x128xf32, #tpu.memory_space<vmem>>, %arg5: memref<1x8x128xf32, #tpu.memory_space<vmem>>) attributes {dimension_semantics = [#tpu.dimension_semantics<parallel>, #tpu.dimension_semantics<arbitrary>], iteration_bounds = array<i64: 2, 2>, scalar_prefetch = 0 : i64, scratch_operands = 0 : i64, tpu.core_type = #tpu.core_type<tc>, window_params = [{transform_indices = @transform_0, window_bounds = array<i64: 1, 18, 72>}, {pipeline_mode = #tpu.pipeline_mode<synchronous>, transform_indices = @transform_1, window_bounds = array<i64: 3, 72, 128>}, {pipeline_mode = #tpu.pipeline_mode<synchronous>, transform_indices = @transform_2, window_bounds = array<i64: 1, 128>}, {transform_indices = @transform_3, window_bounds = array<i64: 1, 8, 128>}]} {
    %c8_i32 = arith.constant 8 : i32
    %0 = arith.muli %arg1, %c8_i32 : i32
    %1 = tpu.assume_multiple %0, 8 : i32
    %c0 = arith.constant 0 : index
    %2 = arith.index_cast %1 : i32 to index
    %c0_0 = arith.constant 0 : index
    %3 = vector.load %arg2[%c0, %2, %c0_0] : memref<1x18x72xf32, #tpu.memory_space<vmem>>, vector<1x8x72xf32>
    %4 = vector.shape_cast %3 : vector<1x8x72xf32> to vector<8x72xf32>
    %c0_1 = arith.constant 0 : index
    %c0_2 = arith.constant 0 : index
    %c0_3 = arith.constant 0 : index
    %5 = vector.load %arg3[%c0_1, %c0_2, %c0_3] : memref<3x72x128xf32, #tpu.memory_space<vmem>>, vector<1x72x128xf32>
    %6 = vector.shape_cast %5 : vector<1x72x128xf32> to vector<72x128xf32>
    %cst = arith.constant dense<0.000000e+00> : vector<8x128xf32>
    %7 = tpu.matmul %4, %6, %cst {dimension_numbers = #tpu.dot_dimension_numbers<[1], [0], [0], [1], [0, 0, 1, 1], [], []>} : vector<8x72xf32>, vector<72x128xf32>, vector<8x128xf32> -> vector<8x128xf32>
    %c1_i32 = arith.constant 1 : i32
    %8 = arith.addi %1, %c1_i32 : i32
    %c0_4 = arith.constant 0 : index
    %9 = arith.index_cast %8 : i32 to index
    %c0_5 = arith.constant 0 : index
    %10 = vector.load %arg2[%c0_4, %9, %c0_5] : memref<1x18x72xf32, #tpu.memory_space<vmem>>, vector<1x8x72xf32>
    %11 = vector.shape_cast %10 : vector<1x8x72xf32> to vector<8x72xf32>
    %c1 = arith.constant 1 : index
    %c0_6 = arith.constant 0 : index
    %c0_7 = arith.constant 0 : index
    %12 = vector.load %arg3[%c1, %c0_6, %c0_7] : memref<3x72x128xf32, #tpu.memory_space<vmem>>, vector<1x72x128xf32>
    %13 = vector.shape_cast %12 : vector<1x72x128xf32> to vector<72x128xf32>
    %cst_8 = arith.constant dense<0.000000e+00> : vector<8x128xf32>
    %14 = tpu.matmul %11, %13, %cst_8 {dimension_numbers = #tpu.dot_dimension_numbers<[1], [0], [0], [1], [0, 0, 1, 1], [], []>} : vector<8x72xf32>, vector<72x128xf32>, vector<8x128xf32> -> vector<8x128xf32>
    %15 = arith.addf %7, %14 : vector<8x128xf32>
    %c2_i32 = arith.constant 2 : i32
    %16 = arith.addi %1, %c2_i32 : i32
    %c0_9 = arith.constant 0 : index
    %17 = arith.index_cast %16 : i32 to index
    %c0_10 = arith.constant 0 : index
    %18 = vector.load %arg2[%c0_9, %17, %c0_10] : memref<1x18x72xf32, #tpu.memory_space<vmem>>, vector<1x8x72xf32>
    %19 = vector.shape_cast %18 : vector<1x8x72xf32> to vector<8x72xf32>
    %c2 = arith.constant 2 : index
    %c0_11 = arith.constant 0 : index
    %c0_12 = arith.constant 0 : index
    %20 = vector.load %arg3[%c2, %c0_11, %c0_12] : memref<3x72x128xf32, #tpu.memory_space<vmem>>, vector<1x72x128xf32>
    %21 = vector.shape_cast %20 : vector<1x72x128xf32> to vector<72x128xf32>
    %cst_13 = arith.constant dense<0.000000e+00> : vector<8x128xf32>
    %22 = tpu.matmul %19, %21, %cst_13 {dimension_numbers = #tpu.dot_dimension_numbers<[1], [0], [0], [1], [0, 0, 1, 1], [], []>} : vector<8x72xf32>, vector<72x128xf32>, vector<8x128xf32> -> vector<8x128xf32>
    %23 = arith.addf %15, %22 : vector<8x128xf32>
    %c0_14 = arith.constant 0 : index
    %c0_15 = arith.constant 0 : index
    %24 = vector.load %arg4[%c0_14, %c0_15] : memref<1x128xf32, #tpu.memory_space<vmem>>, vector<1x128xf32>
    %25 = vector.broadcast %24 : vector<1x128xf32> to vector<8x128xf32>
    %26 = arith.addf %23, %25 : vector<8x128xf32>
    %cst_16 = arith.constant 0.000000e+00 : f32
    %27 = vector.broadcast %cst_16 : f32 to vector<8x128xf32>
    %28 = arith.maximumf %26, %27 : vector<8x128xf32>
    %c0_17 = arith.constant 0 : index
    %c0_18 = arith.constant 0 : index
    %c0_19 = arith.constant 0 : index
    %29 = vector.load %arg5[%c0_17, %c0_18, %c0_19] : memref<1x8x128xf32, #tpu.memory_space<vmem>>, vector<1x8x128xf32>
    %30 = vector.shape_cast %29 : vector<1x8x128xf32> to vector<8x128xf32>
    %31 = vector.shape_cast %28 : vector<8x128xf32> to vector<1x8x128xf32>
    tpu.vector_store %arg5[%c0_17, %c0_18, %c0_19], %31 {strides = array<i32>} : memref<1x8x128xf32, #tpu.memory_space<vmem>>, vector<1x8x128xf32>,
    return
  }
  func.func @transform_0(%arg0: i32, %arg1: i32) -> (i32, i32, i32) {
    %c0_i32 = arith.constant 0 : i32
    %c0_i32_0 = arith.constant 0 : i32
    %c0_i32_1 = arith.constant 0 : i32
    return %arg0, %c0_i32, %c0_i32_0 : i32, i32, i32
  }
  func.func @transform_1(%arg0: i32, %arg1: i32) -> (i32, i32, i32) {
    %c0_i32 = arith.constant 0 : i32
    %c0_i32_0 = arith.constant 0 : i32
    %c0_i32_1 = arith.constant 0 : i32
    %c0_i32_2 = arith.constant 0 : i32
    return %c0_i32, %c0_i32_0, %c0_i32_1 : i32, i32, i32
  }
  func.func @transform_2(%arg0: i32, %arg1: i32) -> (i32, i32) {
    %c0_i32 = arith.constant 0 : i32
    %c0_i32_0 = arith.constant 0 : i32
    %c0_i32_1 = arith.constant 0 : i32
    return %c0_i32, %c0_i32_0 : i32, i32
  }
  func.func @transform_3(%arg0: i32, %arg1: i32) -> (i32, i32, i32) {
    %c0_i32 = arith.constant 0 : i32
    %c0_i32_0 = arith.constant 0 : i32
    return %arg0, %arg1, %c0_i32 : i32, i32, i32
  }
}

</mosaic_0001>

<bundles_post_ra>
// kernel: tile.8
= control target key start
LH: loop header
LB: loop body
LE: loop exit
PB: predicated region body
PF: predicated region fallthrough
CT: control target
= control target key end

     0   :  { %s28_s0 = inlined_call_operand.vmem [shape: f32[8], index: 0, kind: input, shape index: {}]   ;;  %s29_s1 = inlined_call_operand.vmem [shape: f32[16,8], index: 1, kind: output, shape index: {}]  }
   0x1   :  { %v4_v0 = vld [vmem:[%s28_s0] ss:$0 sm:$0xff] }
   0x2   :  { %5 = vst [vmem:[%s29_s1] sm:$0xff] %v4_v0 }
   0x3   :  { %8 = vst [vmem:[%s29_s1 + $0x8] sm:$0xff] %v4_v0 }

// kernel: tile.9
= control target key start
LH: loop header
LB: loop body
LE: loop exit
PB: predicated region body
PF: predicated region fallthrough
CT: control target
= control target key end

     0   :  { %s131_s10 = smov 120   ;;  %s132_s11 = smov 104   ;;  %vm3_vm0 = vcmask 64512   ;;  %vm9_vm1 = vcmask 1048512   ;;  %vm15_vm2 = vcmask 982912   ;;  %vm21_vm3 = vcmask 917312   ;;  %s207_s0 = inlined_call_operand.vmem [shape: f32[16,8], index: 0, kind: input, shape index: {}]   ;;  %s208_s1 = inlined_call_operand.vmem [shape: f32[1,128], index: 1, kind: output, shape index: {}]  }
   0x1   :  { %v101_v0 = vld [vmem:[%s207_s0 + $0xf] sm:$0x1]   ;;  %v103_v1 = vld [vmem:[%s207_s0 + $0xd] sm:$0x1]   ;;  %v105_v2 = vld [vmem:[%s207_s0 + $0xb] sm:$0x1]  }
   0x2   :  { %7 = vrot.lane.b32.xlu0 %v101_v0, %s131_s10  ;;  %19 = vrot.lane.b32.xlu1 %v103_v1, %s132_s11  ;;  %s133_s14 = smov 88   ;;  %v102_v3 = vld [vmem:[%s207_s0 + $0xe] sm:$0x1]   ;;  %v104_v4 = vld [vmem:[%s207_s0 + $0xc] sm:$0x1]   ;;  %s134_s19 = smov 112  }
   0x3   :  { %31 = vrot.lane.b32.xlu2 %v105_v2, %s133_s14  ;;  %s135_s20 = smov 96   ;;  %v106_v5 = vld [vmem:[%s207_s0 + $0xa] sm:$0x1]   ;;  %s136_s23 = smov 80   ;;  %v107_v6 = vld [vmem:[%s207_s0 + $0x9] sm:$0x1]  }
   0x4   :  { %v108_v7 = vld [vmem:[%s207_s0 + $0x8] sm:$0x1]   ;;  %s137_s28 = smov 72   ;;  %s138_s29 = smov 64   ;;  %v109_v8 = vld [vmem:[%s207_s0 + $0x7] sm:$0x1]  }
   0x5   :  { %s139_s3 = smov 56   ;;  %v110_v9 = vld [vmem:[%s207_s0 + $0x6] sm:$0x1]   ;;  %v111_v10 = vld [vmem:[%s207_s0 + $0x5] sm:$0x1]   ;;  %s140_s8 = smov 48  }
   0x6   :  { %s141_s9 = smov 40   ;;  %v112_v11 = vld [vmem:[%s207_s0 + $0x4] sm:$0x1]   ;;  %s142_s12 = smov 32   ;;  %v113_v12 = vld [vmem:[%s207_s0 + $0x3] sm:$0x1]  }
   0x7   :  { %v114_v13 = vld [vmem:[%s207_s0 + $0x2] sm:$0x1]   ;;  %s143_s17 = smov 24   ;;  %s144_s18 = smov 16   ;;  %v115_v14 = vld [vmem:[%s207_s0 + $0x1] sm:$0x1]  }
   0x8   :  { %s145_s21 = smov 8   ;;  %v2_v15 = vld [vmem:[%s207_s0] sm:$0x1]   ;;  %vm27_vm4 = vcmask 851712   ;;  %vm33_vm5 = vcmask 786112   ;;  %vm39_vm6 = vcmask 720512  }
   0x9   :  { %4 = vst.msk [vmem:[#allocation0] sm:$0x1] %vm3_vm0, %v2_v15   ;;  %vm45_vm7 = vcmask 654912   ;;  %vm51_vm8 = vcmask 589312   ;;  %vm57_vm9 = vcmask 523712   ;;  %vm63_vm10 = vcmask 458112  }
   0xa   :  { %13 = vrot.lane.b32.xlu0 %v102_v3, %s134_s19  ;;  %25 = vrot.lane.b32.xlu1 %v104_v4, %s135_s20  ;;  %vm69_vm11 = vcmask 392512   ;;  %vm75_vm12 = vcmask 326912   ;;  %vm81_vm13 = vcmask 261312   ;;  %vm87_vm14 = vcmask 195712  }
   0xb   :  { %37 = vrot.lane.b32.xlu2 %v106_v5, %s136_s23  ;;  %vm93_vm15 = vcmask 130112  }
  0x12   :  { %43 = vrot.lane.b32.xlu0 %v107_v6, %s137_s28  ;;  %49 = vrot.lane.b32.xlu1 %v108_v7, %s138_s29 }
  0x13   :  { %55 = vrot.lane.b32.xlu2 %v109_v8, %s139_s3 }
  0x1a   :  { %61 = vrot.lane.b32.xlu0 %v110_v9, %s140_s8  ;;  %67 = vrot.lane.b32.xlu1 %v111_v10, %s141_s9 }
  0x1b   :  { %73 = vrot.lane.b32.xlu2 %v112_v11, %s142_s12 }
  0x22   :  { %79 = vrot.lane.b32.xlu0 %v113_v12, %s143_s17  ;;  %85 = vrot.lane.b32.xlu1 %v114_v13, %s144_s18 }
  0x23   :  { %91 = vrot.lane.b32.xlu2 %v115_v14, %s145_s21 }
  0x5d   :  { %v32_v16 = vpop.permute.xlu2 %31  }
  0x65   :  { %v38_v17 = vpop.permute.xlu2 %37  }
  0x6d   :  { %v56_v18 = vpop.permute.xlu2 %55  }
  0x74   :  { %v8_v19 = vpop.permute.xlu0 %7   ;;  %v20_v20 = vpop.permute.xlu1 %19  }
  0x75   :  { %10 = vst.msk [vmem:[#allocation0] sm:$0x1] %vm9_vm1, %v8_v19   ;;  %v74_v21 = vpop.permute.xlu2 %73  }
  0x7c   :  { %v14_v22 = vpop.permute.xlu0 %13   ;;  %v26_v23 = vpop.permute.xlu1 %25  }
  0x7d   :  { %16 = vst.msk [vmem:[#allocation0] sm:$0x1] %vm15_vm2, %v14_v22   ;;  %v92_v24 = vpop.permute.xlu2 %91  }
  0x7e   :  { %22 = vst.msk [vmem:[#allocation0] sm:$0x1] %vm21_vm3, %v20_v20  }
  0x7f   :  { %28 = vst.msk [vmem:[#allocation0] sm:$0x1] %vm27_vm4, %v26_v23  }
  0x80   :  { %34 = vst.msk [vmem:[#allocation0] sm:$0x1] %vm33_vm5, %v32_v16  }
  0x81   :  { %40 = vst.msk [vmem:[#allocation0] sm:$0x1] %vm39_vm6, %v38_v17  }
  0x84   :  { %v44_v25 = vpop.permute.xlu0 %43   ;;  %v50_v26 = vpop.permute.xlu1 %49  }
  0x85   :  { %46 = vst.msk [vmem:[#allocation0] sm:$0x1] %vm45_vm7, %v44_v25  }
  0x86   :  { %52 = vst.msk [vmem:[#allocation0] sm:$0x1] %vm51_vm8, %v50_v26  }
  0x87   :  { %58 = vst.msk [vmem:[#allocation0] sm:$0x1] %vm57_vm9, %v56_v18  }
  0x8c   :  { %v62_v27 = vpop.permute.xlu0 %61   ;;  %v68_v28 = vpop.permute.xlu1 %67  }
  0x8d   :  { %64 = vst.msk [vmem:[#allocation0] sm:$0x1] %vm63_vm10, %v62_v27  }
  0x8e   :  { %70 = vst.msk [vmem:[#allocation0] sm:$0x1] %vm69_vm11, %v68_v28  }
  0x8f   :  { %76 = vst.msk [vmem:[#allocation0] sm:$0x1] %vm75_vm12, %v74_v21  }
  0x94   :  { %v80_v29 = vpop.permute.xlu0 %79   ;;  %v86_v30 = vpop.permute.xlu1 %85  }
  0x95   :  { %82 = vst.msk [vmem:[#allocation0] sm:$0x1] %vm81_vm13, %v80_v29  }
  0x96   :  { %88 = vst.msk [vmem:[#allocation0] sm:$0x1] %vm87_vm14, %v86_v30  }
  0x97   :  { %94 = vst.msk [vmem:[#allocation0] sm:$0x1] %vm93_vm15, %v92_v24  }
  0x9e   :  { %v97_v31 = vld [vmem:[#allocation0] sm:$0x1] }
  0x9f   :  { %100 = vst [vmem:[%s208_s1] sm:$0x1] %v97_v31 }

// kernel: conv_relu.1
= control target key start
LH: loop header
LB: loop body
LE: loop exit
PB: predicated region body
PF: predicated region fallthrough
CT: control target
= control target key end

     0   :  { %s533_s12 = smov 0   ;;  %s535_s13 = smov 0   ;;  %s677_s0 = inlined_call_operand.vmem [shape: f32[2,18,72], index: 0, kind: input, shape index: {}]   ;;  %s678_s1 = inlined_call_operand.vmem [shape: f32[3,72,128], index: 1, kind: input, shape index: {}]   ;;  %s679_s2 = inlined_call_operand.vmem [shape: f32[1,128], index: 2, kind: input, shape index: {}]   ;;  %s680_s3 = inlined_call_operand.vmem [shape: f32[2,16,128], index: 3, kind: output, shape index: {}]  }
   0x1   :  { %s537_s14 = smov 0   ;;  %s539_s15 = smov 0  }
   0x2   :  { %s541_s16 = smov 0  }
   0x3 LB: > { %s22_s17 = sadd.s32 1, %s503_s14  ;;  %s25_s18 = sadd.s32 1, %s507_s15  ;;  %s511_s16 = sphi %s541_s16, %s13_s16   ;;  %s507_s15 = sphi %s539_s15, %s684_s15   ;;  %s503_s14 = sphi %s537_s14, %s683_s14   ;;  %s499_s13 = sphi %s535_s13, %s682_s13   ;;  %s495_s12 = sphi %s533_s12, %s681_s12  }
   0x4   : > { %p23_p0 = scmp.ge.s32.totalorder %s22_s17, 2  ;;  %p399_p1 = scmp.ge.s32.totalorder %s511_s16, 1 }
   0x5   : > { %p151_p2 = scmp.lt.s32.totalorder %s511_s16, 5 }
   0x6   : > { %s686_s17 = smov (%p23_p0, %s22_s17), 0  ;;  %s688_s18 = smov (!%p23_p0, %s25_s18), %s507_s15 }
   0x7   : > { %p152_p3 = pnand %p399_p1, %p151_p2  ;;  %p27_p4 = scmp.ge.s32.totalorder %s688_s18, 2 }
   0x8   : > { %p178_p5 = scmp.lt.s32.totalorder (!%p152_p3), %s499_s13, 1  ;;  %s403_s19 = sshll.u32 (!%p152_p3), %s495_s12, 3 }
   0x9   : > { %s690_s18 = smov (%p27_p4, %s688_s18), 0  ;;  %155 = sbr.rel (%p152_p3) target bundleno = 171 (0xab), region = 32 }
   0xa   : > { %p185_p6 = scmp.lt.s32.totalorder (!%p152_p3), %s495_s12, 1 }
   0xe   : > { %v427_v0 = vld [vmem:[%s678_s1 + $0xd0] sm:$0xff]  ;;  %v426_v1 = vld [vmem:[%s678_s1 + $0xc8] sm:$0xff]  ;;  %v202_v3 = vld [vmem:[%s678_s1 + $0x40] sm:$0xff]  ;;  %s692_s13 = smov (!%p178_p5, %s499_s13), 1  ;;  %vm216_vm0 = vcmask 588800   ;;  %s694_s12 = smov (!%p185_p6, %s495_s12), 1 }
   0xf   : > { %v414_v2 = vld [vmem:[%s678_s1 + $0x88] sm:$0xff]  ;;  %286 = vmatpush.msra.mxu2 %v427_v0  ;;  %v413_v4 = vld [vmem:[%s678_s1 + $0x80] sm:$0xff]  ;;  %250 = vmatpush.msra.mxu1 %v202_v3  ;;  %v201_v6 = vld [vmem:[%s678_s1 + $0x38] sm:$0xff]  ;;  %s431_s23 = smul.u32 24, %s692_s13 }
  0x10   : > { %227 = vmatpush.msra.mxu0 %v414_v2  ;;  %v425_v5 = vld [vmem:[%s678_s1 + $0xc0] sm:$0xff]  ;;  %v412_v7 = vld [vmem:[%s678_s1 + $0x78] sm:$0xff]  ;;  %v200_v8 = vld [vmem:[%s678_s1 + $0x30] sm:$0xff] }
  0x11   : > { %287 = vmatpush.msra.mxu2 %v426_v1  ;;  %251 = vmatpush.msra.mxu1 %v201_v6  ;;  %v424_v9 = vld [vmem:[%s678_s1 + $0xb8] sm:$0xff]  ;;  %v411_v10 = vld [vmem:[%s678_s1 + $0x70] sm:$0xff]  ;;  %v199_v11 = vld [vmem:[%s678_s1 + $0x28] sm:$0xff]  ;;  %s182_s11 = scalar_lea.vmem %s677_s0, %s431_s23 }
  0x12   : > { %228 = vmatpush.msra.mxu0 %v413_v4  ;;  %v423_v12 = vld [vmem:[%s678_s1 + $0xb0] sm:$0xff]  ;;  %v410_v13 = vld [vmem:[%s678_s1 + $0x68] sm:$0xff]  ;;  %v198_v14 = vld [vmem:[%s678_s1 + $0x20] sm:$0xff]  ;;  %s192_s23 = scalar_lea.vmem %s182_s11, %s403_s19  ;;  %s401_s19 = sshll.u32 %s692_s13, 1 }
  0x13   : > { %288 = vmatpush.msra.mxu2 %v425_v5  ;;  %252 = vmatpush.msra.mxu1 %v200_v8  ;;  %v422_v15 = vld [vmem:[%s678_s1 + $0xa8] sm:$0xff]  ;;  %v409_v16 = vld [vmem:[%s678_s1 + $0x60] sm:$0xff]  ;;  %v197_v17 = vld [vmem:[%s678_s1 + $0x18] sm:$0xff]  ;;  %s188_s20 = sadd.s32 %s401_s19, %s694_s12 }
  0x14   : > { %229 = vmatpush.msra.mxu0 %v412_v7  ;;  %v421_v18 = vld [vmem:[%s678_s1 + $0xa0] sm:$0xff]  ;;  %v408_v19 = vld [vmem:[%s678_s1 + $0x58] sm:$0xff]  ;;  %v196_v20 = vld [vmem:[%s678_s1 + $0x10] sm:$0xff]  ;;  %s402_s24 = sshll.u32 %s188_s20, 3 }
  0x15   : > { %289 = vmatpush.msra.mxu2 %v424_v9  ;;  %253 = vmatpush.msra.mxu1 %v199_v11  ;;  %v420_v21 = vld [vmem:[%s678_s1 + $0x98] sm:$0xff]  ;;  %v407_v22 = vld [vmem:[%s678_s1 + $0x50] sm:$0xff]  ;;  %v195_v23 = vld [vmem:[%s678_s1 + $0x8] sm:$0xff]  ;;  %s190_s27 = scalar_lea.vmem %s680_s3, %s402_s24 }
  0x16   : > { %230 = vmatpush.msra.mxu0 %v411_v10  ;;  %v419_v24 = vld [vmem:[%s678_s1 + $0x90] sm:$0xff]  ;;  %v406_v25 = vld [vmem:[%s678_s1 + $0x48] sm:$0xff]  ;;  %v194_v27 = vld [vmem:[%s678_s1] sm:$0xff] }
  0x17   : > { %290 = vmatpush.msra.mxu2 %v423_v12  ;;  %254 = vmatpush.msra.mxu1 %v198_v14  ;;  %v418_v26 = vld [vmem:[%s192_s23 + $0x2] sm:$0xff]  ;;  %v472_v33 = vld [vmem:[%s679_s2] ss:$0 sm:$0xff] }
  0x18   : > { %231 = vmatpush.msra.mxu0 %v410_v13  ;;  %v405_v28 = vld [vmem:[%s192_s23 + $0x1] sm:$0xff] }
  0x19   : > { %291 = vmatpush.msra.mxu2 %v422_v15  ;;  %255 = vmatpush.msra.mxu1 %v197_v17  ;;  %v193_v29 = vld [vmem:[%s192_s23] sm:$0xff] }
  0x1a   : > { %232 = vmatpush.msra.mxu0 %v409_v16 }
  0x1b   : > { %292 = vmatpush.msra.mxu2 %v421_v18  ;;  %256 = vmatpush.msra.mxu1 %v196_v20 }
  0x1c   : > { %233 = vmatpush.msra.mxu0 %v408_v19 }
  0x1d   : > { %293 = vmatpush.msra.mxu2 %v420_v21  ;;  %257 = vmatpush.msra.mxu1 %v195_v23 }
  0x1e   : > { %234 = vmatpush.msra.mxu0 %v407_v22 }
  0x1f   : > { %294 = vmatpush.msra.mxu2 %v419_v24  ;;  %258 = vmatpush.msra.mxu1 %v194_v27 }
  0x20   : > { %235 = vmatpush.msra.mxu0 %v406_v25  ;;  %428 = vmatmul.msk.f32.vlgmr.msra.gmra.mxu2 %vm216_vm0, %v418_v26 }
  0x21   : > { %415 = vmatmul.msk.f32.vlgmr.msra.gmra.mxu0 %vm216_vm0, %v405_v28  ;;  %416 = vmatmul.msk.f32.vlgmr.msra.gmra.mxu1 %vm216_vm0, %v193_v29 }
  0x9e   : > { %v237_v30 = vpop.f32.mrf.mxu0  ;;  %v260_v31 = vpop.f32.mrf.mxu1 }
  0x9f   : > { %v261_v32 = vadd.f32 %v260_v31, %v237_v30 }
  0xa3   : > { %v296_v34 = vpop.f32.mrf.mxu2 }
  0xa4   : > { %v299_v35 = vadd.f32 %v296_v34, %v261_v32 }
  0xa6   : > { %v304_v36 = vadd.f32 %v472_v33, %v299_v35 }
  0xa8   : > { %v305_v37 = vmax.f32 %v304_v36, 0.0 }
  0xaa   : > { %306 = vst [vmem:[%s190_s27] sm:$0xff] %v305_v37 }
  0xab PF: > { %s13_s16 = sadd.s32 1, %s511_s16   ;;  %s681_s12 = smov %s503_s14 }
  0xac   : > { %p10_p7 = scmp.ge.s32.totalorder %s13_s16, 6   ;;  %s682_s13 = smov %s507_s15 }
  0xad   : > { %s683_s14 = smov %s686_s17  ;;  %s684_s15 = smov %s690_s18 }
  0xae   :  { %12 = sbr.rel (!%p10_p7) target bundleno = 3 (0x3), region = 67 }

</bundles_post_ra>
